<compile_context>
chip_gen: v6e
topology: v6e:2x2x1
jax: 0.10.0
libtpu: 0.0.40
codegen_flags: <defaults>
</compile_context>

<pallas_src>
import functools

import jax
import jax.numpy as jnp
from jax.experimental import pallas as pl
from jax.experimental.pallas import tpu as pltpu


_LANES = 128
_SUBLANES = 8
# Rows per grid step. 2048 x 128 f32 = 1 MiB per input block.
_MAX_TILE_ROWS = 2048
# Multiple of 16 so bf16 inputs (min tile (16,128)) also tile cleanly.
_ROW_ALIGN = 16
# Padding chosen so the focal loss of a padded element is exactly 0:
#   x = 1e4, t = 1  ->  loss = log1p(exp(-1e4)) = 0, p = 1, (1-p)^g * loss = 0.
_PAD_X = 1e4
_PAD_T = 1.0


def _round_up(a, b):
    return ((a + b - 1) // b) * b


def _focal_elementwise(x, t, gamma):
    """Numerically-stable focal loss, f32 in / f32 out.

    Matches:
      loss = max(x,0) - x*t + log1p(exp(-|x|))   (BCE-with-logits, 'none')
      p    = exp(-loss)                          (computed algebraically here)
      f    = (1-p)**gamma * loss
    """
    mx = jnp.maximum(x, 0.0)
    e = jnp.exp(-jnp.abs(x))                       # EUP #1 (reused twice)
    loss = mx - x * t + jnp.log1p(e)               # EUP #2
    # exp(-loss) == exp(x*t - max(x,0)) / (1 + e); exponent <= 0 for t in [0,1].
    p = jnp.exp(x * t - mx) / (1.0 + e)            # EUP #3 (+ reciprocal)
    one_minus_p = 1.0 - p

    g = float(gamma)
    if g == int(g) and 0 <= int(g) <= 8:
        gi = int(g)
        if gi == 0:
            w = jnp.ones_like(one_minus_p)
        else:
            w = one_minus_p
            for _ in range(gi - 1):                # gamma=2 -> one extra vmul
                w = w * one_minus_p
    else:
        w = one_minus_p ** g                       # fallback: pow
    return w * loss


def _focal_partial_sum_kernel(x_ref, t_ref, out_ref, *, gamma):
    x = x_ref[...].astype(jnp.float32)
    t = t_ref[...].astype(jnp.float32)
    f = _focal_elementwise(x, t, gamma)
    # Reduce the row tile down to one lane/sublane-dense (8,128) vreg using
    # VPU adds only; the single cross-lane reduce happens once in the wrapper.
    out_ref[...] = f.reshape(-1, _SUBLANES, _LANES).sum(axis=0)[None]


def _focal_noreduce_kernel(x_ref, t_ref, out_ref, *, gamma):
    x = x_ref[...].astype(jnp.float32)
    t = t_ref[...].astype(jnp.float32)
    out_ref[...] = _focal_elementwise(x, t, gamma).astype(out_ref.dtype)


def focal_loss(inputs, targets, gamma: float = 2.0, reduce: bool = True):
    """Pallas TPU implementation of FocalLoss.forward (any input shape)."""
    orig_shape = inputs.shape
    orig_dtype = inputs.dtype
    n = inputs.size

    rows = pl.cdiv(n, _LANES)
    tile_rows = min(_MAX_TILE_ROWS, _round_up(rows, _ROW_ALIGN))
    padded_rows = _round_up(rows, tile_rows)
    padded_n = padded_rows * _LANES
    grid = (padded_rows // tile_rows,)

    x_flat = inputs.reshape(-1)
    t_flat = targets.reshape(-1)
    pad = padded_n - n
    if pad:
        x_flat = jnp.pad(x_flat, (0, pad), constant_values=_PAD_X)
        t_flat = jnp.pad(t_flat, (0, pad), constant_values=_PAD_T)
    x2 = x_flat.reshape(padded_rows, _LANES)
    t2 = t_flat.reshape(padded_rows, _LANES)

    in_blk = pl.BlockSpec((tile_rows, _LANES), lambda i: (i, 0))

    if reduce:
        kernel = functools.partial(_focal_partial_sum_kernel, gamma=gamma)
        partials = pl.pallas_call(
            kernel,
            out_shape=jax.ShapeDtypeStruct(
                (grid[0], _SUBLANES, _LANES), jnp.float32),
            grid_spec=pltpu.PrefetchScalarGridSpec(
                num_scalar_prefetch=0,
                grid=grid,
                in_specs=[in_blk, in_blk],
                out_specs=pl.BlockSpec((1, _SUBLANES, _LANES),
                                       lambda i: (i, 0, 0)),
            ),
            compiler_params=pltpu.CompilerParams(
                dimension_semantics=("parallel",)),
        )(x2, t2)
        # Tiny final reduce + mean scaling outside the kernel; the 'parallel'
        # grid axis lets both v7x TensorCores process disjoint tiles.
        return jnp.sum(partials) * jnp.float32(1.0 / n)
    else:
        kernel = functools.partial(_focal_noreduce_kernel, gamma=gamma)
        out = pl.pallas_call(
            kernel,
            out_shape=jax.ShapeDtypeStruct((padded_rows, _LANES), orig_dtype),
            grid_spec=pltpu.PrefetchScalarGridSpec(
                num_scalar_prefetch=0,
                grid=grid,
                in_specs=[in_blk, in_blk],
                out_specs=in_blk,
            ),
            compiler_params=pltpu.CompilerParams(
                dimension_semantics=("parallel",)),
        )(x2, t2)
        return out.reshape(-1)[:n].reshape(orig_shape)


def _focal_loss_ref(inputs, targets, gamma=2.0, reduce=True):
    """Direct translation of the PyTorch module (pure JAX reference)."""
    x = inputs.astype(jnp.float32)
    t = targets.astype(jnp.float32)
    loss = jnp.maximum(x, 0.0) - x * t + jnp.log1p(jnp.exp(-jnp.abs(x)))
    p = jnp.exp(-loss)
    f = (1.0 - p) ** gamma * loss
    return f.mean() if reduce else f


if __name__ == "__main__":
    key = jax.random.PRNGKey(0)
    k1, k2 = jax.random.split(key)

    # Small NCHW segmentation-style shape for FocalLoss.
    shape = (2, 4, 16, 16)
    logits = jax.random.normal(k1, shape, dtype=jnp.float32)
    targets = (jax.random.uniform(k2, shape) > 0.5).astype(jnp.float32)

    # reduce=True (module default)
    out = focal_loss(logits, targets, gamma=2.0, reduce=True)
    out = jax.block_until_ready(out)
    ref = _focal_loss_ref(logits, targets, gamma=2.0, reduce=True)
    assert jnp.allclose(out, ref, rtol=2e-5, atol=1e-6), (out, ref)

    # reduce=False path
    out_nr = focal_loss(logits, targets, gamma=2.0, reduce=False)
    out_nr = jax.block_until_ready(out_nr)
    ref_nr = _focal_loss_ref(logits, targets, gamma=2.0, reduce=False)
    assert jnp.allclose(out_nr, ref_nr, rtol=2e-5, atol=1e-6)

    print("KERNEL_OK")
</pallas_src>

<mosaic_0001>
module attributes {stable_mosaic.version = 11 : i64} {
  func.func @_focal_partial_sum_kernel(%arg0: i32, %arg1: memref<16x128xf32, #tpu.memory_space<vmem>>, %arg2: memref<16x128xf32, #tpu.memory_space<vmem>>, %arg3: memref<1x8x128xf32, #tpu.memory_space<vmem>>) attributes {dimension_semantics = [#tpu.dimension_semantics<parallel>], iteration_bounds = array<i64: 1>, scalar_prefetch = 0 : i64, scratch_operands = 0 : i64, tpu.core_type = #tpu.core_type<tc>, window_params = [{transform_indices = @transform_0, window_bounds = array<i64: 16, 128>}, {transform_indices = @transform_1, window_bounds = array<i64: 16, 128>}, {transform_indices = @transform_2, window_bounds = array<i64: 1, 8, 128>}]} {
    %c0 = arith.constant 0 : index
    %c0_0 = arith.constant 0 : index
    %0 = vector.load %arg1[%c0, %c0_0] : memref<16x128xf32, #tpu.memory_space<vmem>>, vector<16x128xf32>
    %c0_1 = arith.constant 0 : index
    %c0_2 = arith.constant 0 : index
    %1 = vector.load %arg2[%c0_1, %c0_2] : memref<16x128xf32, #tpu.memory_space<vmem>>, vector<16x128xf32>
    %cst = arith.constant 0.000000e+00 : f32
    %2 = vector.broadcast %cst : f32 to vector<16x128xf32>
    %3 = arith.maximumf %0, %2 : vector<16x128xf32>
    %4 = math.absf %0 : vector<16x128xf32>
    %cst_3 = arith.constant 0.000000e+00 : f32
    %5 = vector.broadcast %cst_3 : f32 to vector<16x128xf32>
    %6 = arith.subf %5, %4 : vector<16x128xf32>
    %7 = math.exp %6 : vector<16x128xf32>
    %8 = arith.mulf %0, %1 : vector<16x128xf32>
    %9 = arith.subf %3, %8 : vector<16x128xf32>
    %10 = math.log1p %7 : vector<16x128xf32>
    %11 = arith.addf %9, %10 : vector<16x128xf32>
    %12 = arith.mulf %0, %1 : vector<16x128xf32>
    %13 = arith.subf %12, %3 : vector<16x128xf32>
    %14 = math.exp %13 : vector<16x128xf32>
    %cst_4 = arith.constant 1.000000e+00 : f32
    %15 = vector.broadcast %cst_4 : f32 to vector<16x128xf32>
    %16 = arith.addf %15, %7 : vector<16x128xf32>
    %17 = arith.divf %14, %16 : vector<16x128xf32>
    %cst_5 = arith.constant 1.000000e+00 : f32
    %18 = vector.broadcast %cst_5 : f32 to vector<16x128xf32>
    %19 = arith.subf %18, %17 : vector<16x128xf32>
    %20 = arith.mulf %19, %19 : vector<16x128xf32>
    %21 = arith.mulf %20, %11 : vector<16x128xf32>
    %22 = vector.shape_cast %21 : vector<16x128xf32> to vector<2x8x128xf32>
    %cst_6 = arith.constant dense<0.000000e+00> : vector<8x128xf32>
    %23 = vector.multi_reduction <add>, %22, %cst_6 [0] : vector<2x8x128xf32> to vector<8x128xf32>
    %24 = vector.shape_cast %23 : vector<8x128xf32> to vector<1x8x128xf32>
    %c0_7 = arith.constant 0 : index
    %c0_8 = arith.constant 0 : index
    %c0_9 = arith.constant 0 : index
    %25 = vector.load %arg3[%c0_7, %c0_8, %c0_9] : memref<1x8x128xf32, #tpu.memory_space<vmem>>, vector<1x8x128xf32>
    tpu.vector_store %arg3[%c0_7, %c0_8, %c0_9], %24 {strides = array<i32>} : memref<1x8x128xf32, #tpu.memory_space<vmem>>, vector<1x8x128xf32>,
    return
  }
  func.func @transform_0(%arg0: i32) -> (i32, i32) {
    %c0_i32 = arith.constant 0 : i32
    %c0_i32_0 = arith.constant 0 : i32
    return %arg0, %c0_i32 : i32, i32
  }
  func.func @transform_1(%arg0: i32) -> (i32, i32) {
    %c0_i32 = arith.constant 0 : i32
    %c0_i32_0 = arith.constant 0 : i32
    return %arg0, %c0_i32 : i32, i32
  }
  func.func @transform_2(%arg0: i32) -> (i32, i32, i32) {
    %c0_i32 = arith.constant 0 : i32
    %c0_i32_0 = arith.constant 0 : i32
    %c0_i32_1 = arith.constant 0 : i32
    return %arg0, %c0_i32, %c0_i32_0 : i32, i32, i32
  }
}

</mosaic_0001>

<bundles_post_ra>
// kernel: tpu_custom_call.1
= control target key start
LH: loop header
LB: loop body
LE: loop exit
PB: predicated region body
PF: predicated region fallthrough
CT: control target
= control target key end

     0   :  { %7 = vsyncpa [#allocation3], 0  ;;  %s230_s0 = inlined_call_operand.hbm [shape: f32[16,128], index: 0, kind: input, shape index: {}]   ;;  %s231_s1 = inlined_call_operand.hbm [shape: f32[16,128], index: 1, kind: input, shape index: {}]   ;;  %s232_s2 = inlined_call_operand.hbm [shape: f32[1,8,128], index: 2, kind: output, shape index: {}]  }
   0x1   :  { %8 = vsyncpa [#allocation6], 0 }
   0x2   :  { %9 = vsyncpa [#allocation4], 0  ;;  %s201_s9 = smov [#allocation2]  }
   0x3   :  { %s15_s10 = sshll.u32 %s201_s9, 4  ;;  %s16_s10 = int_to_ptr.vmem [resolvable:$true] %s15_s10 }
   0x4   :  { %s143_s11 = scalar_lea.vmem %s16_s10, 256  ;;  %p148_p1 = scmp.lt.s32.totalorder %s16_s10, %s16_s10 }
   0x5   :  { %p144_p0 = scmp.ne.s32.totalorder %s16_s10, %s143_s11  ;;  %p149_p2 = scmp.lt.s32.totalorder %s143_s11, %s143_s11 }
   0x7   :  { %p150_p3 = por %p149_p2, %p148_p1 }
   0x9   :  { %p151_p4 = pnand %p150_p3, %p144_p0 }
   0xb   :  { %154 = shalt.err (!%p151_p4)
}
   0xc   :  { %s202_s12 = smov 128   ;;  %s203_s13 = smov 8  }
   0xd   :  { %21 = dma.hbm_to_vmem [thread:$0]  %s230_s0, 256, %s16_s10, [#allocation3], %s202_s12, %s202_s12, %s203_s13  }
   0xe   :  { %s204_s16 = smov [#allocation5]  }
   0xf   :  { %s27_s17 = sshll.u32 %s204_s16, 4  ;;  %s28_s17 = int_to_ptr.vmem [resolvable:$true] %s27_s17 }
  0x10   :  { %s163_s18 = scalar_lea.vmem %s28_s17, 256  ;;  %p168_p6 = scmp.lt.s32.totalorder %s28_s17, %s28_s17 }
  0x11   :  { %p164_p5 = scmp.ne.s32.totalorder %s28_s17, %s163_s18  ;;  %p169_p7 = scmp.lt.s32.totalorder %s163_s18, %s163_s18 }
  0x13   :  { %p170_p8 = por %p169_p7, %p168_p6 }
  0x15   :  { %p171_p9 = pnand %p170_p8, %p164_p5 }
  0x17   :  { %174 = shalt.err (!%p171_p9)
}
  0x18   :  { %33 = dma.hbm_to_vmem [thread:$0]  %s231_s1, 256, %s28_s17, [#allocation6], %s202_s12, %s202_s12, %s203_s13  }
  0x19   :  { %195 = dma.done.wait [#allocation3], 256  }
  0x1a   :  { %196 = vsyncadd [#allocation3], 4294967040 }
  0x1b   :  { %197 = dma.done.wait [#allocation6], 256  }
  0x1c   :  { %198 = vsyncadd [#allocation6], 4294967040  ;;  %v40_v0 = vld [vmem:[#allocation2] sm:$0xff]  ;;  %v41_v1 = vld [vmem:[#allocation2 + $0x8] sm:$0xff]  ;;  %s205_s0 = smov [#allocation7]  }
  0x1d   :  { %v46_v2 = vand.u32 2147483647, %v40_v0  ;;  %v47_v3 = vand.u32 2147483647, %v41_v1  ;;  %v42_v7 = vld [vmem:[#allocation5] sm:$0xff]  ;;  %v43_v9 = vld [vmem:[#allocation5 + $0x8] sm:$0xff] }
  0x1e   :  { %v44_v10 = vmax.f32 %v40_v0, 0.0  ;;  %v54_v11 = vmul.f32 %v42_v7, %v40_v0  ;;  %v45_v12 = vmax.f32 %v41_v1, 0.0  ;;  %v55_v13 = vmul.f32 %v43_v9, %v41_v1  ;;  %s104_s1 = sshll.u32 %s205_s0, 4  ;;  %s105_s1 = int_to_ptr.vmem [resolvable:$true] %s104_s1 }
  0x1f   :  { %v48_v4 = vsub.f32 0.0, %v46_v2  ;;  %v49_v5 = vsub.f32 0.0, %v47_v3  ;;  %s175_s21 = scalar_lea.vmem %s105_s1, 128  ;;  %p180_p11 = scmp.lt.s32.totalorder %s105_s1, %s105_s1 }
  0x20   :  { %v78_v14 = vsub.f32 %v54_v11, %v44_v10  ;;  %v79_v15 = vsub.f32 %v55_v13, %v45_v12  ;;  %v56_v34 = vsub.f32 %v44_v10, %v54_v11  ;;  %v57_v37 = vsub.f32 %v45_v12, %v55_v13  ;;  %p176_p10 = scmp.ne.s32.totalorder %s105_s1, %s175_s21  ;;  %p181_p12 = scmp.lt.s32.totalorder %s175_s21, %s175_s21 }
  0x21   :  { %v50_v6 = vmul.f32 1.442695, %v48_v4  ;;  %v52_v8 = vmul.f32 1.442695, %v49_v5 }
  0x22   :  { %v80_v16 = vmul.f32 1.442695, %v78_v14  ;;  %v82_v17 = vmul.f32 1.442695, %v79_v15  ;;  %p182_p13 = por %p181_p12, %p180_p11 }
  0x23   :  { %119 = vpow2.f32 %v50_v6 }
  0x24   :  { %121 = vpow2.f32 %v52_v8  ;;  %p183_p0 = pnand %p182_p13, %p176_p10 }
  0x25   :  { %123 = vpow2.f32 %v80_v16 }
  0x26   :  { %125 = vpow2.f32 %v82_v17 }
  0x30   :  { %v120_v18 = vpop.eup %119 }
  0x31   :  { %v122_v19 = vpop.eup %121  ;;  %v58_v20 = vadd.f32 1.0, %v120_v18  ;;  %v61_v22 = vmul.f32 -0.5, %v120_v18  ;;  %v64_v25 = vand.u32 2147483647, %v120_v18 }
  0x32   :  { %v67_v21 = vadd.f32 1.0, %v122_v19  ;;  %v70_v23 = vmul.f32 -0.5, %v122_v19  ;;  %v73_v27 = vand.u32 2147483647, %v122_v19  ;;  %v124_v28 = vpop.eup %123 }
  0x33   :  { %127 = vlog2.f32 %v58_v20  ;;  %v62_v24 = vadd.f32 1.0, %v61_v22  ;;  %v126_v29 = vpop.eup %125  ;;  %vm65_vm0 = vcmp.lt.f32.partialorder %v64_v25, 0.0004427343 }
  0x34   :  { %129 = vlog2.f32 %v67_v21  ;;  %v71_v26 = vadd.f32 1.0, %v70_v23  ;;  %vm74_vm1 = vcmp.lt.f32.partialorder %v73_v27, 0.0004427343 }
  0x35   :  { %131 = vrcp.f32 %v58_v20  ;;  %v63_v30 = vmul.f32 %v120_v18, %v62_v24 }
  0x36   :  { %133 = vrcp.f32 %v67_v21  ;;  %v72_v32 = vmul.f32 %v122_v19, %v71_v26 }
  0x40   :  { %v128_v31 = vpop.eup %127 }
  0x41   :  { %v130_v33 = vpop.eup %129  ;;  %v60_v35 = vmul.f32 0.6931472, %v128_v31 }
  0x42   :  { %v132_v36 = vpop.eup %131  ;;  %v69_v38 = vmul.f32 0.6931472, %v130_v33 }
  0x43   :  { %v134_v39 = vpop.eup %133  ;;  %v66_v40 = vsel %vm65_vm0, %v63_v30, %v60_v35  ;;  %v87_v41 = vmul.f32 %v132_v36, %v124_v28 }
  0x44   :  { %v75_v42 = vsel %vm74_vm1, %v72_v32, %v69_v38  ;;  %v89_v43 = vmul.f32 %v134_v39, %v126_v29  ;;  %v76_v44 = vadd.f32 %v66_v40, %v56_v34 }
  0x45   :  { %v90_v45 = vsub.f32 1.0, %v87_v41  ;;  %v77_v46 = vadd.f32 %v75_v42, %v57_v37 }
  0x46   :  { %v91_v47 = vsub.f32 1.0, %v89_v43 }
  0x47   :  { %v92_v48 = vmul.f32 %v90_v45, %v90_v45 }
  0x48   :  { %v93_v49 = vmul.f32 %v91_v47, %v91_v47 }
  0x49   :  { %v94_v50 = vmul.f32 %v92_v48, %v76_v44 }
  0x4a   :  { %v95_v51 = vmul.f32 %v93_v49, %v77_v46 }
  0x4c   :  { %v96_v52 = vadd.f32 %v95_v51, %v94_v50 }
  0x4e   :  { %97 = vst [vmem:[#allocation7] sm:$0xff] %v96_v52 }
  0x4f   :  { %186 = shalt.err (!%p183_p0)
}
  0x50   :  { %107 = dma.vmem_to_hbm [thread:$0]  %s105_s1, 128, %s232_s2, [#allocation4]  }
  0x51   :  { %199 = dma.done.wait [#allocation4], 128  }
  0x52   :  { %200 = vsyncadd [#allocation4], 4294967168 }
  0x53   :  { %111 = vsyncpa [#allocation3], 1 }
  0x54   :  { %112 = vsyncpa [#allocation6], 1 }
  0x55   :  { %113 = vsyncpa [#allocation4], 1 }

</bundles_post_ra>
